<compile_context>
chip_gen: v7x
topology: tpu7x:2x2x1
jax: 0.10.0
libtpu: 0.0.40
codegen_flags: <defaults>
</compile_context>

<pallas_src>
import jax
import jax.numpy as jnp
from jax.experimental import pallas as pl
from jax.experimental.pallas import tpu as pltpu


def linear_probe_kernel(x_ref, w_ref, b_ref, out_ref):
    # x_ref  : [TB, C, S]    batch block; channels on sublanes, spatial on lanes
    # w_ref  : [C, Kpad]     fused (frozen backbone projection @ probe weight), lane-padded
    # b_ref  : [1, Kpad]     probe bias, lane-padded with zeros
    # out_ref: [TB, Kpad]    padded logits for this batch block
    x = x_ref[...]                                   # [TB, C, S] f32

    # backbone.forward_head(pre_logits=True): global average pool over spatial.
    # Lane-dense reduce over the last axis (XLU); pooling commutes with the
    # (linear) stand-in backbone projection, so it happens first.
    pooled = jnp.mean(x, axis=2)                     # [TB, C]

    # Fused backbone-projection + linear probe: logits = pooled @ W_fused + b.
    logits = jnp.dot(pooled, w_ref[...],
                     preferred_element_type=jnp.float32) + b_ref[...]  # [TB, Kpad]

    out_ref[...] = logits.astype(out_ref.dtype)


def prepare_probe_params(wb, wl_t, bl):
    """One-time weight prep (NOT in the per-forward path).

    wb   : [C, F]  frozen stand-in backbone projection weight
    wl_t : [F, K]  probe weight, pre-transposed (nn.Linear weight.T)
    bl   : [K]     probe bias
    Returns (w_fused_pad [C, Kpad], bl_pad [1, Kpad], K).
    """
    F, K = wl_t.shape
    Kpad = ((K + 127) // 128) * 128                  # lane-dense output width
    wl_pad = jnp.zeros((F, Kpad), wl_t.dtype).at[:, :K].set(wl_t)
    bl_pad = jnp.zeros((1, Kpad), bl.dtype).at[0, :K].set(bl)
    # Fuse the two linear stages: [C, F] @ [F, Kpad] -> [C, Kpad].
    w_fused_pad = wb @ wl_pad
    return w_fused_pad, bl_pad, K


def linear_probe_forward(x_nchw, w_fused_pad, bl_pad, num_classes):
    """x_nchw: [B, C, H, W] float32. Returns logits [B, num_classes]."""
    B, C, H, W = x_nchw.shape
    Kpad = w_fused_pad.shape[1]
    S = H * W

    # NCHW -> [B, C, S]: pure reshape (no transpose); spatial sits on the lane axis.
    x_bcs = x_nchw.reshape(B, C, S)

    # Batch block size: amortize per-step overhead and fill MXU rows.
    # (128 saturates an MXU pass on v5e; 256 on v6e/v7x; toy B=2 -> one step.)
    TB = min(B, 256)
    if B % TB != 0:
        TB = B                                       # fallback: single full-batch block
    grid = (B // TB,)

    cost = pl.CostEstimate(
        flops=B * (C * S + 2 * C * Kpad),
        transcendentals=0,
        bytes_accessed=4 * (x_bcs.size + w_fused_pad.size
                            + bl_pad.size + B * Kpad),
    )

    out = pl.pallas_call(
        linear_probe_kernel,
        out_shape=jax.ShapeDtypeStruct((B, Kpad), jnp.float32),
        grid_spec=pltpu.PrefetchScalarGridSpec(
            num_scalar_prefetch=0,
            grid=grid,
            in_specs=[
                pl.BlockSpec((TB, C, S), lambda b: (b, 0, 0)),   # batch block
                pl.BlockSpec((C, Kpad), lambda b: (0, 0)),       # fused weight: resident
                pl.BlockSpec((1, Kpad), lambda b: (0, 0)),       # bias: resident
            ],
            out_specs=pl.BlockSpec((TB, Kpad), lambda b: (b, 0)),
        ),
        compiler_params=pltpu.CompilerParams(
            dimension_semantics=("parallel",),       # shard batch blocks across TCs (v7x)
        ),
        cost_estimate=cost,
    )(x_bcs, w_fused_pad, bl_pad)

    return out[:, :num_classes]                      # drop lane padding


def reference_forward(x_nchw, wb, wl_t, bl):
    # Reference keeps the original "project every location, then pool, then
    # probe" order, validating the pool-first + weight-fusion rewrites exactly.
    B, C, H, W = x_nchw.shape
    x_bsc = jnp.transpose(x_nchw, (0, 2, 3, 1)).reshape(B, H * W, C)
    fm = jnp.einsum("bsc,cf->bsf", x_bsc, wb)
    feats = jnp.mean(fm, axis=1)
    return feats @ wl_t + bl[None, :]


if __name__ == "__main__":
    # Small shapes consistent with the module's forward.
    B, C, H, W = 2, 4, 16, 16
    num_features, num_classes = 32, 8

    key = jax.random.PRNGKey(0)
    kx, kwb, kwl, kbl = jax.random.split(key, 4)

    x = jax.random.normal(kx, (B, C, H, W), dtype=jnp.float32)

    # Frozen stand-in backbone projection weight (deterministic).
    wb = jax.random.normal(kwb, (C, num_features), dtype=jnp.float32) * 0.1

    # nn.Linear(num_features, num_classes) default init:
    # U(-1/sqrt(in), 1/sqrt(in)) for weight and bias.
    bound = 1.0 / (num_features ** 0.5)
    wl = jax.random.uniform(kwl, (num_classes, num_features),
                            minval=-bound, maxval=bound, dtype=jnp.float32)
    bl = jax.random.uniform(kbl, (num_classes,),
                            minval=-bound, maxval=bound, dtype=jnp.float32)
    wl_t = wl.T  # [F, K]

    # One-time weight prep (padding + fusion), hoisted out of the forward path.
    w_fused_pad, bl_pad, K = prepare_probe_params(wb, wl_t, bl)

    logits = linear_probe_forward(x, w_fused_pad, bl_pad, num_classes)
    jax.block_until_ready(logits)

    ref = reference_forward(x, wb, wl_t, bl)
    assert logits.shape == (B, num_classes)
    assert jnp.allclose(logits, ref, atol=1e-4, rtol=1e-4), "mismatch vs reference"

    print("KERNEL_OK")
</pallas_src>

<mosaic_0001>
module attributes {stable_mosaic.version = 11 : i64} {
  func.func @linear_probe_kernel(%arg0: i32, %arg1: memref<2x4x256xf32, #tpu.memory_space<vmem>>, %arg2: memref<4x128xf32, #tpu.memory_space<vmem>>, %arg3: memref<1x128xf32, #tpu.memory_space<vmem>>, %arg4: memref<2x128xf32, #tpu.memory_space<vmem>>) attributes {dimension_semantics = [#tpu.dimension_semantics<parallel>], iteration_bounds = array<i64: 1>, scalar_prefetch = 0 : i64, scratch_operands = 0 : i64, tpu.core_type = #tpu.core_type<tc>, window_params = [{transform_indices = @transform_0, window_bounds = array<i64: 2, 4, 256>}, {pipeline_mode = #tpu.pipeline_mode<synchronous>, transform_indices = @transform_1, window_bounds = array<i64: 4, 128>}, {pipeline_mode = #tpu.pipeline_mode<synchronous>, transform_indices = @transform_2, window_bounds = array<i64: 1, 128>}, {transform_indices = @transform_3, window_bounds = array<i64: 2, 128>}]} {
    %c0 = arith.constant 0 : index
    %c0_0 = arith.constant 0 : index
    %c0_1 = arith.constant 0 : index
    %0 = vector.load %arg1[%c0, %c0_0, %c0_1] : memref<2x4x256xf32, #tpu.memory_space<vmem>>, vector<2x4x256xf32>
    %cst = arith.constant dense<0.000000e+00> : vector<2x4xf32>
    %1 = vector.multi_reduction <add>, %0, %cst [2] : vector<2x4x256xf32> to vector<2x4xf32>
    %cst_2 = arith.constant 2.560000e+02 : f32
    %2 = vector.broadcast %cst_2 : f32 to vector<2x4xf32>
    %3 = arith.divf %1, %2 : vector<2x4xf32>
    %c0_3 = arith.constant 0 : index
    %c0_4 = arith.constant 0 : index
    %4 = vector.load %arg2[%c0_3, %c0_4] : memref<4x128xf32, #tpu.memory_space<vmem>>, vector<4x128xf32>
    %cst_5 = arith.constant dense<0.000000e+00> : vector<2x128xf32>
    %5 = tpu.matmul %3, %4, %cst_5 {dimension_numbers = #tpu.dot_dimension_numbers<[1], [0], [0], [1], [0, 0, 1, 1], [], []>} : vector<2x4xf32>, vector<4x128xf32>, vector<2x128xf32> -> vector<2x128xf32>
    %c0_6 = arith.constant 0 : index
    %c0_7 = arith.constant 0 : index
    %6 = vector.load %arg3[%c0_6, %c0_7] : memref<1x128xf32, #tpu.memory_space<vmem>>, vector<1x128xf32>
    %7 = vector.broadcast %6 : vector<1x128xf32> to vector<2x128xf32>
    %8 = arith.addf %5, %7 : vector<2x128xf32>
    %c0_8 = arith.constant 0 : index
    %c0_9 = arith.constant 0 : index
    %9 = vector.load %arg4[%c0_8, %c0_9] : memref<2x128xf32, #tpu.memory_space<vmem>>, vector<2x128xf32>
    tpu.vector_store %arg4[%c0_8, %c0_9], %8 {strides = array<i32>} : memref<2x128xf32, #tpu.memory_space<vmem>>, vector<2x128xf32>,
    return
  }
  func.func @transform_0(%arg0: i32) -> (i32, i32, i32) {
    %c0_i32 = arith.constant 0 : i32
    %c0_i32_0 = arith.constant 0 : i32
    %c0_i32_1 = arith.constant 0 : i32
    return %arg0, %c0_i32, %c0_i32_0 : i32, i32, i32
  }
  func.func @transform_1(%arg0: i32) -> (i32, i32) {
    %c0_i32 = arith.constant 0 : i32
    %c0_i32_0 = arith.constant 0 : i32
    %c0_i32_1 = arith.constant 0 : i32
    return %c0_i32, %c0_i32_0 : i32, i32
  }
  func.func @transform_2(%arg0: i32) -> (i32, i32) {
    %c0_i32 = arith.constant 0 : i32
    %c0_i32_0 = arith.constant 0 : i32
    %c0_i32_1 = arith.constant 0 : i32
    return %c0_i32, %c0_i32_0 : i32, i32
  }
  func.func @transform_3(%arg0: i32) -> (i32, i32) {
    %c0_i32 = arith.constant 0 : i32
    %c0_i32_0 = arith.constant 0 : i32
    return %arg0, %c0_i32 : i32, i32
  }
}

</mosaic_0001>

<bundles_post_ra>
// kernel: tpu_custom_call.1
= control target key start
LH: loop header
LB: loop body
LE: loop exit
PB: predicated region body
PF: predicated region fallthrough
CT: control target
= control target key end

     0   :  { %8 = vsyncpa [#allocation3], 0  ;;  %s340_s0 = inlined_call_operand.hbm [shape: f32[2,4,256], index: 0, kind: input, shape index: {}]   ;;  %s341_s1 = inlined_call_operand.hbm [shape: f32[4,128], index: 1, kind: input, shape index: {}]   ;;  %s342_s2 = inlined_call_operand.vmem [shape: f32[1,128], index: 2, kind: input, shape index: {}]   ;;  %s343_s3 = inlined_call_operand.hbm [shape: f32[2,128], index: 3, kind: output, shape index: {}]  }
   0x1   :  { %9 = vsyncpa [#allocation6], 0 }
   0x2   :  { %10 = vsyncpa [#allocation4], 0  ;;  %s269_s12 = smov [#allocation2]   ;;  %s197_s16 = scalar_lea.hbm %s340_s0, 256 }
   0x3   :  { %s16_s13 = sshll.u32 %s269_s12, 4  ;;  %p198_p0 = scmp.ne.s32.totalorder %s340_s0, %s197_s16  ;;  %s17_s13 = int_to_ptr.vmem [resolvable:$true] %s16_s13 }
   0x4   :  { %p201_p1 = scmp.lt.u32.totalorder %s197_s16, %s340_s0 }
   0x6   :  { %p203_p2 = pnand %p201_p1, %p198_p0 }
   0x8   :  { %206 = shalt.err (!%p203_p2)
}
   0x9   :  { %s207_s21 = scalar_lea.vmem %s17_s13, 256  ;;  %p212_p4 = scmp.lt.s32.totalorder %s17_s13, %s17_s13 }
   0xa   :  { %p208_p3 = scmp.ne.s32.totalorder %s17_s13, %s207_s21  ;;  %p213_p5 = scmp.lt.s32.totalorder %s207_s21, %s207_s21 }
   0xc   :  { %p214_p6 = por %p213_p5, %p212_p4 }
   0xe   :  { %p215_p7 = pnand %p214_p6, %p208_p3 }
  0x10   :  { %218 = shalt.err (!%p215_p7)
}
  0x11   :  { %s270_s22 = smov 128   ;;  %s271_s23 = smov 8  }
  0x12   :  { %22 = dma.hbm_to_vmem [thread:$0]  %s340_s0, 256, %s17_s13, [#allocation3], %s270_s22, %s270_s22, %s271_s23  }
  0x13   :  { %s272_s26 = smov [#allocation5]   ;;  %s219_s30 = scalar_lea.hbm %s341_s1, 64 }
  0x14   :  { %s29_s27 = sshll.u32 %s272_s26, 4  ;;  %p220_p8 = scmp.ne.s32.totalorder %s341_s1, %s219_s30  ;;  %s30_s27 = int_to_ptr.vmem [resolvable:$true] %s29_s27 }
  0x15   :  { %p223_p9 = scmp.lt.u32.totalorder %s219_s30, %s341_s1 }
  0x17   :  { %p225_p10 = pnand %p223_p9, %p220_p8 }
  0x19   :  { %228 = shalt.err (!%p225_p10)
}
  0x1a   :  { %s229_s8 = scalar_lea.vmem %s30_s27, 64  ;;  %p234_p12 = scmp.lt.s32.totalorder %s30_s27, %s30_s27 }
  0x1b   :  { %p230_p11 = scmp.ne.s32.totalorder %s30_s27, %s229_s8  ;;  %p235_p13 = scmp.lt.s32.totalorder %s229_s8, %s229_s8 }
  0x1d   :  { %p236_p0 = por %p235_p13, %p234_p12 }
  0x1f   :  { %p237_p1 = pnand %p236_p0, %p230_p11 }
  0x21   :  { %240 = shalt.err (!%p237_p1)
}
  0x22   :  { %32 = dma.hbm_to_vmem [thread:$0]  %s341_s1, 64, %s30_s27, [#allocation6]  }
  0x23   :  { %263 = dma.done.wait [#allocation3], 256  }
  0x24   :  { %264 = vsyncadd [#allocation3], 4294967040 }
  0x25   :  { %265 = dma.done.wait [#allocation6], 64  }
  0x26   :  { %266 = vsyncadd [#allocation6], 4294967232  ;;  %vm49_vm0 = vcmask 1043456   ;;  %v41_v0 = vld [vmem:[#allocation2] sm:$0xff]  ;;  %v42_v1 = vld [vmem:[#allocation2 + $0x8] sm:$0xff]  ;;  %v273_v11 = vmov 0.0   ;;  %v73_v12 = vlaneseq }
  0x27   :  { %v45_v2 = vcombine.high %v41_v0, %v41_v0  ;;  %v50_v3 = vsel %vm49_vm0, %v41_v0, 0.0  ;;  %v46_v4 = vcombine.high %v42_v1, %v42_v1  ;;  %v55_v6 = vsel %vm49_vm0, %v42_v1, 0.0  ;;  %v63_v10 = vld [vmem:[#allocation5] sm:$0xf]  ;;  %183 = vmatprep.subr.mxu0 %v273_v11  ;;  %v178_v23 = vld [vmem:[%s342_s2] ss:$0 sm:$0xff] }
  0x28   :  { %vm274_vm1 = vmmov 0   ;;  %184 = vmatpush3.msk.msra.mxu0 %vm49_vm0, %v63_v10  ;;  %v74_v13 = vand.u32 127, %v73_v12  ;;  %v76_v14 = vshrl.u32 %v73_v12, 7  ;;  %vm83_vm2 = vcmask 1041409   ;;  %s275_s11 = smov [#allocation7]  }
  0x29   :  { %v51_v5 = vsel %vm49_vm0, %v45_v2, 0.0  ;;  %v56_v7 = vsel %vm49_vm0, %v46_v4, 0.0  ;;  %185 = vmatprep.mubr.msk.f32.mxu0 %vm274_vm1, %v273_v11  ;;  %vm85_vm3 = vcmask 31744   ;;  %s168_s12 = sshll.u32 %s275_s11, 4  ;;  %s169_s12 = int_to_ptr.vmem [resolvable:$true] %s168_s12 }
  0x2a   :  { %v52_v8 = vadd.f32 %v51_v5, %v50_v3  ;;  %v57_v9 = vadd.f32 %v56_v7, %v55_v6  ;;  %v77_v16 = vsub.s32 %v74_v13, %v76_v14  ;;  %s241_s13 = scalar_lea.vmem %s169_s12, 32  ;;  %p246_p3 = scmp.lt.s32.totalorder %s169_s12, %s169_s12 }
  0x2b   :  { %p242_p2 = scmp.ne.s32.totalorder %s169_s12, %s241_s13  ;;  %p247_p4 = scmp.lt.s32.totalorder %s241_s13, %s241_s13 }
  0x2c   :  { %53 = vadd.xlane.f32.xlu0 %v52_v8 }
  0x2d   :  { %p248_p5 = por %p247_p4, %p246_p3 }
  0x2f   :  { %p249_p6 = pnand %p248_p5, %p242_p2 }
  0x30   :  { %58 = vadd.xlane.f32.xlu0 %v57_v9 }
  0xb9   :  { %v54_v15 = vpop.xlane.xlu0 %53 }
  0xba   :  { %v61_v17 = vmul.f32 0.00390625, %v54_v15 }
  0xbc   :  { %v78_v20 = vrot.slane %v61_v17, %v77_v16 }
  0xbd   :  { %v59_v18 = vpop.xlane.xlu0 %58 }
  0xbe   :  { %v62_v19 = vmul.f32 0.00390625, %v59_v18 }
  0xc0   :  { %v82_v21 = vrot.slane %v62_v19, %v77_v16 }
  0xc2   :  { %v84_v22 = vsel %vm83_vm2, %v82_v21, %v78_v20 }
  0xc3   :  { %186 = vmatmul.mubr.msk.f32.vlgmr.msra.gmra.mrb[0].mxu0 %vm85_vm3, %v84_v22 }
 0x196   :  { %v157_v24 = vpop.f32.mrb[0].mxu0 }
 0x197   :  { %v158_v25 = vadd.f32 %v178_v23, %v157_v24  ;;  %v187_v26 = vpop.f32.mrb[1].mxu0 }
 0x199   :  { %161 = vst [vmem:[#allocation7] sm:$0x3] %v158_v25 }
 0x19a   :  { %252 = shalt.err (!%p249_p6)
}
 0x19b   :  { %s253_s16 = scalar_lea.hbm %s343_s3, 32 }
 0x19c   :  { %p254_p7 = scmp.ne.s32.totalorder %s343_s3, %s253_s16  ;;  %p257_p8 = scmp.lt.u32.totalorder %s253_s16, %s343_s3 }
 0x19e   :  { %p259_p9 = pnand %p257_p8, %p254_p7 }
 0x1a0   :  { %262 = shalt.err (!%p259_p9)
}
 0x1a1   :  { %171 = dma.vmem_to_hbm [thread:$0]  %s169_s12, 32, %s343_s3, [#allocation4]  }
 0x1a2   :  { %267 = dma.done.wait [#allocation4], 32  }
 0x1a3   :  { %268 = vsyncadd [#allocation4], 4294967264 }
 0x1a4   :  { %175 = vsyncpa [#allocation3], 1 }
 0x1a5   :  { %176 = vsyncpa [#allocation6], 1 }
 0x1a6   :  { %177 = vsyncpa [#allocation4], 1 }

</bundles_post_ra>
